<compile_context>
chip_gen: v5e
topology: v5e:2x2
jax: 0.10.0
libtpu: 0.0.40
codegen_flags: <defaults>
</compile_context>

<pallas_src>
import jax
import jax.numpy as jnp
from jax.experimental import pallas as pl
from jax.experimental.pallas import tpu as pltpu

NEG_SLOPE = -0.2629397
KH = 3            # conv kernel height (kernel width is 1)
C_OUT = 2         # conv output channels
PAD = 2           # symmetric padding on H and W


def conv_leaky_kernel(w_ref, x_ref, o_ref, xp_ref):
    # w_ref  : SMEM f32[C_OUT*KH]          flattened conv weights
    # x_ref  : VMEM (N, H, W)              raw input, channel dim squeezed
    # o_ref  : VMEM (N, C_OUT, H+2, W+4)   output (NCHW, matches PyTorch)
    # xp_ref : VMEM (N, H+4, W)            scratch: H-padded input
    n, h, wdt = x_ref.shape
    hout = h + 2 * PAD - (KH - 1)          # = h + 2

    # ---- Fused H zero-padding via scratch ref (plain stores/loads, no concat).
    xp_ref[...] = jnp.zeros_like(xp_ref)
    xp_ref[:, PAD:PAD + h, :] = x_ref[...]

    # Three vertical taps read back as ref slices (vector loads).
    a0 = xp_ref[:, 0:hout, :]              # (N, Hout, W)
    a1 = xp_ref[:, 1:1 + hout, :]
    a2 = xp_ref[:, 2:2 + hout, :]

    # ---- Read the 6 scalar weights once.
    w00 = w_ref[0]
    w01 = w_ref[1]
    w02 = w_ref[2]
    w10 = w_ref[3]
    w11 = w_ref[4]
    w12 = w_ref[5]

    # ---- Both output channels in one slab; single select; single interior store.
    acc0 = w00 * a0 + w01 * a1 + w02 * a2          # (N, Hout, W)
    acc1 = w10 * a0 + w11 * a1 + w12 * a2
    acc = jnp.stack([acc0, acc1], axis=1)          # (N, C_OUT, Hout, W) - non-minor axis
    y = jnp.where(acc > 0, acc, acc * NEG_SLOPE)

    # Zero-fill whole output once (covers the 2+2 zero W-pad columns), then
    # store only the interior columns.  Kernel width is 1, so pad columns are
    # exactly zero and stay zero through the leaky-where.
    o_ref[...] = jnp.zeros_like(o_ref)
    o_ref[:, :, :, PAD:PAD + wdt] = y


def model_forward(x, w):
    """x: (N, 1, H, W) f32, w: (2, 1, 3, 1) f32 -> (N, 2, H+2, W+4) f32."""
    n, cin, h, wdt = x.shape
    assert cin == 1
    hout = h + 2 * PAD - (KH - 1)          # padding=2, kernel height 3, stride 1
    wout = wdt + 2 * PAD                   # kernel width 1

    x3 = x.reshape(n, h, wdt).astype(jnp.float32)          # squeeze channel dim
    w_flat = w.reshape(C_OUT * KH).astype(jnp.float32)     # 1-D SMEM weights

    return pl.pallas_call(
        conv_leaky_kernel,
        out_shape=jax.ShapeDtypeStruct((n, C_OUT, hout, wout), jnp.float32),
        in_specs=[
            pl.BlockSpec(memory_space=pltpu.MemorySpace.SMEM),   # weights
            pl.BlockSpec(memory_space=pltpu.MemorySpace.VMEM),   # full input
        ],
        out_specs=pl.BlockSpec(memory_space=pltpu.MemorySpace.VMEM),
        scratch_shapes=[pltpu.VMEM((n, h + 2 * PAD, wdt), jnp.float32)],
    )(w_flat, x3)


if __name__ == "__main__":
    key = jax.random.PRNGKey(0)
    kx, kw = jax.random.split(key)

    N, H, W = 2, 16, 16
    x = jax.random.normal(kx, (N, 1, H, W), dtype=jnp.float32)

    # Deterministic Conv2d weight init (kaiming-uniform-style bound, fan_in=3)
    bound = 1.0 / (3.0 ** 0.5)
    w = jax.random.uniform(kw, (C_OUT, 1, KH, 1), dtype=jnp.float32,
                           minval=-bound, maxval=bound)

    out = model_forward(x, w)
    out = jax.block_until_ready(out)

    # Reference check with XLA conv (NCHW / OIHW)
    ref = jax.lax.conv_general_dilated(
        x, w, window_strides=(1, 1), padding=((2, 2), (2, 2)),
        dimension_numbers=("NCHW", "OIHW", "NCHW"))
    ref = jnp.where(ref > 0, ref, ref * NEG_SLOPE)
    assert out.shape == (N, C_OUT, H + 2, W + 4)
    assert jnp.allclose(out, ref, atol=1e-5, rtol=1e-5)

    print("KERNEL_OK")
</pallas_src>

<mosaic_0001>
module attributes {stable_mosaic.version = 11 : i64} {
  func.func @conv_leaky_kernel(%arg0: memref<6xf32, #tpu.memory_space<smem>>, %arg1: memref<2x16x16xf32, #tpu.memory_space<vmem>>, %arg2: memref<2x2x18x20xf32, #tpu.memory_space<vmem>>, %arg3: memref<2x20x16xf32, #tpu.memory_space<vmem>>) attributes {dimension_semantics = [], scalar_prefetch = 0 : i64, scratch_operands = 1 : i64, tpu.core_type = #tpu.core_type<tc>} {
    %cst = arith.constant 0.000000e+00 : f32
    %0 = vector.broadcast %cst : f32 to vector<2x20x16xf32>
    %c0 = arith.constant 0 : index
    %c0_0 = arith.constant 0 : index
    %c0_1 = arith.constant 0 : index
    %1 = vector.load %arg3[%c0, %c0_0, %c0_1] : memref<2x20x16xf32, #tpu.memory_space<vmem>>, vector<2x20x16xf32>
    tpu.vector_store %arg3[%c0, %c0_0, %c0_1], %0 {strides = array<i32>} : memref<2x20x16xf32, #tpu.memory_space<vmem>>, vector<2x20x16xf32>,
    %c0_2 = arith.constant 0 : index
    %c0_3 = arith.constant 0 : index
    %c0_4 = arith.constant 0 : index
    %2 = vector.load %arg1[%c0_2, %c0_3, %c0_4] : memref<2x16x16xf32, #tpu.memory_space<vmem>>, vector<2x16x16xf32>
    %c0_5 = arith.constant 0 : index
    %c2 = arith.constant 2 : index
    %c0_6 = arith.constant 0 : index
    %3 = vector.load %arg3[%c0_5, %c2, %c0_6] : memref<2x20x16xf32, #tpu.memory_space<vmem>>, vector<2x16x16xf32>
    tpu.vector_store %arg3[%c0_5, %c2, %c0_6], %2 {strides = array<i32>} : memref<2x20x16xf32, #tpu.memory_space<vmem>>, vector<2x16x16xf32>,
    %c0_7 = arith.constant 0 : index
    %c0_8 = arith.constant 0 : index
    %c0_9 = arith.constant 0 : index
    %4 = vector.load %arg3[%c0_7, %c0_8, %c0_9] : memref<2x20x16xf32, #tpu.memory_space<vmem>>, vector<2x18x16xf32>
    %c0_10 = arith.constant 0 : index
    %c1 = arith.constant 1 : index
    %c0_11 = arith.constant 0 : index
    %5 = vector.load %arg3[%c0_10, %c1, %c0_11] : memref<2x20x16xf32, #tpu.memory_space<vmem>>, vector<2x18x16xf32>
    %c0_12 = arith.constant 0 : index
    %c2_13 = arith.constant 2 : index
    %c0_14 = arith.constant 0 : index
    %6 = vector.load %arg3[%c0_12, %c2_13, %c0_14] : memref<2x20x16xf32, #tpu.memory_space<vmem>>, vector<2x18x16xf32>
    %c0_15 = arith.constant 0 : index
    %7 = memref.load %arg0[%c0_15] : memref<6xf32, #tpu.memory_space<smem>>
    %c1_16 = arith.constant 1 : index
    %8 = memref.load %arg0[%c1_16] : memref<6xf32, #tpu.memory_space<smem>>
    %c2_17 = arith.constant 2 : index
    %9 = memref.load %arg0[%c2_17] : memref<6xf32, #tpu.memory_space<smem>>
    %c3 = arith.constant 3 : index
    %10 = memref.load %arg0[%c3] : memref<6xf32, #tpu.memory_space<smem>>
    %c4 = arith.constant 4 : index
    %11 = memref.load %arg0[%c4] : memref<6xf32, #tpu.memory_space<smem>>
    %c5 = arith.constant 5 : index
    %12 = memref.load %arg0[%c5] : memref<6xf32, #tpu.memory_space<smem>>
    %13 = vector.broadcast %7 : f32 to vector<2x18x16xf32>
    %14 = arith.mulf %13, %4 : vector<2x18x16xf32>
    %15 = vector.broadcast %8 : f32 to vector<2x18x16xf32>
    %16 = arith.mulf %15, %5 : vector<2x18x16xf32>
    %17 = arith.addf %14, %16 : vector<2x18x16xf32>
    %18 = vector.broadcast %9 : f32 to vector<2x18x16xf32>
    %19 = arith.mulf %18, %6 : vector<2x18x16xf32>
    %20 = arith.addf %17, %19 : vector<2x18x16xf32>
    %21 = vector.broadcast %10 : f32 to vector<2x18x16xf32>
    %22 = arith.mulf %21, %4 : vector<2x18x16xf32>
    %23 = vector.broadcast %11 : f32 to vector<2x18x16xf32>
    %24 = arith.mulf %23, %5 : vector<2x18x16xf32>
    %25 = arith.addf %22, %24 : vector<2x18x16xf32>
    %26 = vector.broadcast %12 : f32 to vector<2x18x16xf32>
    %27 = arith.mulf %26, %6 : vector<2x18x16xf32>
    %28 = arith.addf %25, %27 : vector<2x18x16xf32>
    %29 = vector.shape_cast %20 : vector<2x18x16xf32> to vector<2x1x18x16xf32>
    %30 = vector.shape_cast %28 : vector<2x18x16xf32> to vector<2x1x18x16xf32>
    %31 = tpu.concatenate %29, %30 in 1 : vector<2x1x18x16xf32>, vector<2x1x18x16xf32> -> vector<2x2x18x16xf32>
    %cst_18 = arith.constant 0.000000e+00 : f32
    %32 = vector.broadcast %cst_18 : f32 to vector<2x2x18x16xf32>
    %33 = arith.cmpf ogt, %31, %32 : vector<2x2x18x16xf32>
    %cst_19 = arith.constant -0.262939692 : f32
    %34 = vector.broadcast %cst_19 : f32 to vector<2x2x18x16xf32>
    %35 = arith.mulf %31, %34 : vector<2x2x18x16xf32>
    %36 = arith.select %33, %31, %35 : vector<2x2x18x16xi1>, vector<2x2x18x16xf32>
    %cst_20 = arith.constant 0.000000e+00 : f32
    %37 = vector.broadcast %cst_20 : f32 to vector<2x2x18x20xf32>
    %c0_21 = arith.constant 0 : index
    %c0_22 = arith.constant 0 : index
    %c0_23 = arith.constant 0 : index
    %c0_24 = arith.constant 0 : index
    %38 = vector.load %arg2[%c0_21, %c0_22, %c0_23, %c0_24] : memref<2x2x18x20xf32, #tpu.memory_space<vmem>>, vector<2x2x18x20xf32>
    tpu.vector_store %arg2[%c0_21, %c0_22, %c0_23, %c0_24], %37 {strides = array<i32>} : memref<2x2x18x20xf32, #tpu.memory_space<vmem>>, vector<2x2x18x20xf32>,
    %c0_25 = arith.constant 0 : index
    %c0_26 = arith.constant 0 : index
    %c0_27 = arith.constant 0 : index
    %c2_28 = arith.constant 2 : index
    %39 = vector.load %arg2[%c0_25, %c0_26, %c0_27, %c2_28] : memref<2x2x18x20xf32, #tpu.memory_space<vmem>>, vector<2x2x18x16xf32>
    tpu.vector_store %arg2[%c0_25, %c0_26, %c0_27, %c2_28], %36 {strides = array<i32>} : memref<2x2x18x20xf32, #tpu.memory_space<vmem>>, vector<2x2x18x16xf32>,
    return
  }
}

</mosaic_0001>

<bundles_post_ra>
// kernel: tpu_custom_call.1
= control target key start
LH: loop header
LB: loop body
LE: loop exit
PB: predicated region body
PF: predicated region fallthrough
CT: control target
= control target key end

     0   :  { %7 = vsyncpa [#allocation5], 0  ;;  %s521_s0 = inlined_call_operand.hbm [shape: f32[6], index: 0, kind: input, shape index: {}]   ;;  %s522_s1 = inlined_call_operand.hbm [shape: f32[2,16,16], index: 1, kind: input, shape index: {}]   ;;  %s523_s2 = inlined_call_operand.vmem [shape: f32[2,2,18,20], index: 2, kind: output, shape index: {}]  }
   0x1   :  { %s14_s11 = sshll.u32 %s521_s0, 4  ;;  %s15_s11 = int_to_ptr.hbm [resolvable:$true] %s14_s11 }
   0x2   :  { %8 = vsyncpa [#allocation4], 0  ;;  %s22_s14 = sshll.u32 %s522_s1, 4  ;;  %s315_s15 = smov [#allocation3]   ;;  %s23_s14 = int_to_ptr.hbm [resolvable:$true] %s22_s14 }
   0x3   :  { %17 = dma.hbm_to_smem %s15_s11, 16, %s315_s15, [#allocation5]  }
   0x4   :  { %s316_s16 = smov [#allocation6]   ;;  %s317_s18 = smov 128  }
   0x5   :  { %s24_s17 = sshll.u32 %s316_s16, 4  ;;  %s318_s19 = smov 8   ;;  %s25_s17 = int_to_ptr.vmem [resolvable:$true] %s24_s17 }
   0x6   :  { %30 = dma.hbm_to_vmem [thread:$0]  %s23_s14, 512, %s25_s17, [#allocation4], %s317_s18, %s317_s18, %s318_s19  }
   0x7   :  { %311 = dma.done.wait [#allocation5], 16  }
   0x8   :  { %312 = vsyncadd [#allocation5], 4294967280 }
   0x9   :  { %313 = dma.done.wait [#allocation4], 512  }
   0xa   :  { %314 = vsyncadd [#allocation4], 4294966784 }
   0xb   :  { %39 = sfence }
   0xc   :  { %vm40_vm0 = vcmask 130048   ;;  %vm43_vm1 = vcmask 125952   ;;  %s74_s0 = sld [smem:[#allocation3]]  ;;  %v319_v0 = vmov 0.0   ;;  %v49_v1 = vld [vmem:[#allocation6 + $0x8] sm:$0xff]  ;;  %v48_v2 = vld [vmem:[#allocation6] sm:$0xff] }
   0xd   :  { %42 = vst.msk [vmem:[#allocation2 + $0x8] sm:$0xff] %vm40_vm0, %v319_v0  ;;  %s264_s1 = sld [smem:[#allocation3 + $0x1]]  ;;  %v50_v3 = vld [vmem:[#allocation6 + $0x10] sm:$0xff]  ;;  %v51_v4 = vld [vmem:[#allocation6 + $0x18] sm:$0xff]  ;;  %s320_s24 = smov 2   ;;  %vm185_vm8 = vcmask 156672  }
   0xe   :  { %44 = vst.msk [vmem:[#allocation2 + $0x10] sm:$0xf] %vm43_vm1, %v319_v0  ;;  %s265_s20 = sld [smem:[#allocation3 + $0x2]]  ;;  %vm182_vm15 = vcmask 162816  }
   0xf   :  { %47 = vst.msk [vmem:[#allocation2 + $0x28] sm:$0xf] %vm43_vm1, %v319_v0  ;;  %s266_s21 = sld [smem:[#allocation3 + $0x3]]  ;;  %vm247_vm1 = vcmask 140304  }
  0x10   :  { %53 = vst.msk [vmem:[#allocation2 + $0xa] sm:$0xff] %vm40_vm0, %v49_v1  ;;  %s267_s22 = sld [smem:[#allocation3 + $0x4]] }
  0x11   :  { %41 = vst.msk [vmem:[#allocation2] sm:$0xff] %vm40_vm0, %v319_v0  ;;  %s268_s23 = sld [smem:[#allocation3 + $0x5]] }
  0x12   :  { %45 = vst.msk [vmem:[#allocation2 + $0x18] sm:$0xff] %vm40_vm0, %v319_v0  ;;  %v356_v6 = vstv %s74_s0 }
  0x13   :  { %46 = vst.msk [vmem:[#allocation2 + $0x20] sm:$0xff] %vm40_vm0, %v319_v0  ;;  %v358_v7 = vstv %s264_s1 }
  0x14   :  { %52 = vst.msk [vmem:[#allocation2 + $0x2] sm:$0xff] %vm40_vm0, %v48_v2  ;;  %v360_v8 = vstv %s265_s20 }
  0x15   :  { %v354_v5 = vld [vmem:[#allocation2 + $0x12] sm:$0x3]  ;;  %54 = vst.msk [vmem:[#allocation2 + $0x1a] sm:$0xff] %vm40_vm0, %v50_v3  ;;  %v374_v16 = vstv %s266_s21 }
  0x16   :  { %55 = vst.msk [vmem:[#allocation2 + $0x22] sm:$0xff] %vm40_vm0, %v51_v4  ;;  %v103_v13 = vmul.f32 %v360_v8, %v354_v5  ;;  %v376_v17 = vstv %s267_s22  ;;  %vm244_vm0 = vcmask 146448  }
  0x17   :  { %v364_v9 = vld [vmem:[#allocation2 + $0x10] sm:$0x3]  ;;  %v378_v18 = vstv %s268_s23  ;;  %186 = vst.msk [vmem:[%s523_s2 + $0x10] sm:$0x3] %vm185_vm8, %v319_v0 }
  0x18   :  { %v366_v10 = vld [vmem:[#allocation2 + $0x11] sm:$0x3]  ;;  %v83_v11 = vmul.f32 %v356_v6, %v364_v9  ;;  %189 = vst.msk [vmem:[%s523_s2 + $0x28] sm:$0x3] %vm185_vm8, %v319_v0 }
  0x19   :  { %v90_v12 = vmul.f32 %v358_v7, %v366_v10  ;;  %v69_v14 = vld [vmem:[#allocation2 + $0xa] sm:$0xff]  ;;  %192 = vst.msk [vmem:[%s523_s2 + $0x40] sm:$0x3] %vm185_vm8, %v319_v0 }
  0x1a   :  { %v102_v22 = vmul.f32 %v360_v8, %v69_v14  ;;  %v135_v58 = vmul.f32 %v378_v18, %v69_v14  ;;  %195 = vst.msk [vmem:[%s523_s2 + $0x58] sm:$0x3] %vm185_vm8, %v319_v0 }
  0x1b   :  { %v96_v15 = vadd.f32 %v90_v12, %v83_v11  ;;  %v56_v19 = vld [vmem:[#allocation2] sm:$0xff]  ;;  %v57_v27 = vld [vmem:[#allocation2 + $0x8] sm:$0xff]  ;;  %188 = vst.msk [vmem:[%s523_s2 + $0x20] sm:$0xff] %vm182_vm15, %v319_v0 }
  0x1c   :  { %v62_v20 = vld [vmem:[#allocation2 + $0x1] sm:$0xff]  ;;  %v81_v24 = vmul.f32 %v356_v6, %v56_v19  ;;  %v63_v28 = vld [vmem:[#allocation2 + $0x9] sm:$0xff]  ;;  %v59_v29 = vld [vmem:[#allocation2 + $0x18] sm:$0xff]  ;;  %v114_v30 = vmul.f32 %v374_v16, %v56_v19  ;;  %v82_v33 = vmul.f32 %v356_v6, %v57_v27  ;;  %v115_v55 = vmul.f32 %v374_v16, %v57_v27  ;;  %183 = vst.msk [vmem:[%s523_s2] sm:$0xff] %vm182_vm15, %v319_v0 }
  0x1d   :  { %v68_v21 = vld [vmem:[#allocation2 + $0x2] sm:$0xff]  ;;  %v109_v23 = vadd.f32 %v103_v13, %v96_v15  ;;  %v88_v25 = vmul.f32 %v358_v7, %v62_v20  ;;  %v121_v31 = vmul.f32 %v376_v17, %v62_v20  ;;  %v89_v39 = vmul.f32 %v358_v7, %v63_v28  ;;  %v65_v40 = vld [vmem:[#allocation2 + $0x19] sm:$0xff]  ;;  %184 = vst.msk [vmem:[%s523_s2 + $0x8] sm:$0xff] %vm182_vm15, %v319_v0 }
  0x1e   :  { %v101_v26 = vmul.f32 %v360_v8, %v68_v21  ;;  %v134_v32 = vmul.f32 %v378_v18, %v68_v21  ;;  %v60_v34 = vld [vmem:[#allocation2 + $0x20] sm:$0xff]  ;;  %v84_v48 = vmul.f32 %v356_v6, %v59_v29  ;;  %v91_v52 = vmul.f32 %v358_v7, %v65_v40  ;;  %v61_v15 = vld [vmem:[#allocation2 + $0x28] sm:$0x3]  ;;  %187 = vst.msk [vmem:[%s523_s2 + $0x18] sm:$0xff] %vm182_vm15, %v319_v0 }
  0x1f   :  { %v66_v35 = vld [vmem:[#allocation2 + $0x21] sm:$0xff]  ;;  %vm148_vm2 = vcmp.gt.f32.partialorder %v109_v23, 0.0  ;;  %v160_v37 = vmul.f32 -0.2629397, %v109_v23  ;;  %v94_v38 = vadd.f32 %v88_v25, %v81_v24  ;;  %v127_v41 = vadd.f32 %v121_v31, %v114_v30  ;;  %v67_v19 = vld [vmem:[#allocation2 + $0x29] sm:$0x3] }
  0x20   :  { %v72_v36 = vld [vmem:[#allocation2 + $0x22] sm:$0xff]  ;;  %v85_v42 = vmul.f32 %v356_v6, %v60_v34  ;;  %v92_v43 = vmul.f32 %v358_v7, %v66_v35  ;;  %v95_v47 = vadd.f32 %v89_v39, %v82_v33  ;;  %v71_v51 = vld [vmem:[#allocation2 + $0x1a] sm:$0xff]  ;;  %v97_v60 = vadd.f32 %v91_v52, %v84_v48  ;;  %v73_v30 = vld [vmem:[#allocation2 + $0x2a] sm:$0x3]  ;;  %190 = vst.msk [vmem:[%s523_s2 + $0x30] sm:$0xff] %vm182_vm15, %v319_v0 }
  0x21   :  { %v105_v44 = vmul.f32 %v360_v8, %v72_v36  ;;  %v172_v45 = vsel %vm148_vm2, %v109_v23, %v160_v37  ;;  %v107_v46 = vadd.f32 %v101_v26, %v94_v38  ;;  %v140_v49 = vadd.f32 %v134_v32, %v127_v41  ;;  %191 = vst.msk [vmem:[%s523_s2 + $0x38] sm:$0xff] %vm182_vm15, %v319_v0 }
  0x22   :  { %212 = vrot.lane.b32.xlu1 %v172_v45, %s320_s24  ;;  %v98_v50 = vadd.f32 %v92_v43, %v85_v42  ;;  %v108_v54 = vadd.f32 %v102_v22, %v95_v47  ;;  %v104_v61 = vmul.f32 %v360_v8, %v71_v51  ;;  %v122_v62 = vmul.f32 %v376_v17, %v63_v28 }
  0x23   :  { %vm146_vm3 = vcmp.gt.f32.partialorder %v107_v46, 0.0  ;;  %v158_v53 = vmul.f32 -0.2629397, %v107_v46  ;;  %vm149_vm4 = vcmp.gt.f32.partialorder %v140_v49, 0.0  ;;  %v161_v56 = vmul.f32 -0.2629397, %v140_v49 }
  0x24   :  { %v111_v57 = vadd.f32 %v105_v44, %v98_v50  ;;  %v159_v63 = vmul.f32 -0.2629397, %v108_v54  ;;  %v128_v2 = vadd.f32 %v122_v62, %v115_v55  ;;  %v118_v3 = vmul.f32 %v374_v16, %v60_v34  ;;  %193 = vst.msk [vmem:[%s523_s2 + $0x48] sm:$0xff] %vm182_vm15, %v319_v0 }
  0x25   :  { %v170_v59 = vsel %vm146_vm3, %v107_v46, %v158_v53  ;;  %v173_v1 = vsel %vm149_vm4, %v140_v49, %v161_v56  ;;  %v125_v4 = vmul.f32 %v376_v17, %v66_v35  ;;  %vm147_vm5 = vcmp.gt.f32.partialorder %v108_v54, 0.0  ;;  %194 = vst.msk [vmem:[%s523_s2 + $0x50] sm:$0xff] %vm182_vm15, %v319_v0 }
  0x26   :  { %208 = vrot.lane.b32.xlu0 %v170_v59, %s320_s24  ;;  %vm153_vm6 = vcmp.gt.f32.partialorder %v111_v57, 0.0  ;;  %v110_v11 = vadd.f32 %v104_v61, %v97_v60  ;;  %v141_v12 = vadd.f32 %v135_v58, %v128_v2  ;;  %v138_v14 = vmul.f32 %v378_v18, %v72_v36 }
  0x27   :  { %v131_v13 = vadd.f32 %v125_v4, %v118_v3  ;;  %v117_v20 = vmul.f32 %v374_v16, %v59_v29  ;;  %v124_v21 = vmul.f32 %v376_v17, %v65_v40  ;;  %v116_v22 = vmul.f32 %v374_v16, %v364_v9 }
  0x28   :  { %v123_v23 = vmul.f32 %v376_v17, %v366_v10  ;;  %v171_v24 = vsel %vm147_vm5, %v108_v54, %v159_v63  ;;  %v165_v25 = vmul.f32 -0.2629397, %v111_v57  ;;  %vm150_vm7 = vcmp.gt.f32.partialorder %v141_v12, 0.0 }
  0x29   :  { %v162_v26 = vmul.f32 -0.2629397, %v141_v12  ;;  %v136_v28 = vmul.f32 %v378_v18, %v354_v5  ;;  %v86_v31 = vmul.f32 %v356_v6, %v61_v15  ;;  %v93_v29 = vmul.f32 %v358_v7, %v67_v19 }
  0x2a   :  { %214 = vrot.lane.b32.xlu1 %v173_v1, %s320_s24  ;;  %v129_v27 = vadd.f32 %v123_v23, %v116_v22  ;;  %v164_v32 = vmul.f32 -0.2629397, %v110_v11  ;;  %v137_v9 = vmul.f32 %v378_v18, %v71_v51  ;;  %v144_v10 = vadd.f32 %v138_v14, %v131_v13 }
  0x2b   :  { %v174_v33 = vsel %vm150_vm7, %v141_v12, %v162_v26  ;;  %v130_v34 = vadd.f32 %v124_v21, %v117_v20  ;;  %v177_v36 = vsel %vm153_vm6, %v111_v57, %v165_v25  ;;  %vm152_vm9 = vcmp.gt.f32.partialorder %v110_v11, 0.0 }
  0x2c   :  { %216 = vrot.lane.b32.xlu2 %v174_v33, %s320_s24  ;;  %v142_v35 = vadd.f32 %v136_v28, %v129_v27  ;;  %v99_v5 = vadd.f32 %v93_v29, %v86_v31  ;;  %v106_v6 = vmul.f32 %v360_v8, %v73_v30  ;;  %v176_v8 = vsel %vm152_vm9, %v110_v11, %v164_v32 }
  0x2d   :  { %vm156_vm11 = vcmp.gt.f32.partialorder %v144_v10, 0.0  ;;  %v168_v37 = vmul.f32 -0.2629397, %v144_v10  ;;  %v143_v38 = vadd.f32 %v137_v9, %v130_v34  ;;  %v119_v41 = vmul.f32 %v374_v16, %v61_v15 }
  0x2e   :  { %210 = vrot.lane.b32.xlu0 %v171_v24, %s320_s24  ;;  %vm151_vm10 = vcmp.gt.f32.partialorder %v142_v35, 0.0  ;;  %v163_v7 = vmul.f32 -0.2629397, %v142_v35  ;;  %v112_v40 = vadd.f32 %v106_v6, %v99_v5  ;;  %v126_v42 = vmul.f32 %v376_v17, %v67_v19 }
  0x2f   :  { %v180_v43 = vsel %vm156_vm11, %v144_v10, %v168_v37  ;;  %v167_v44 = vmul.f32 -0.2629397, %v143_v38  ;;  %v139_v47 = vmul.f32 %v378_v18, %v73_v30  ;;  %vm155_vm12 = vcmp.gt.f32.partialorder %v143_v38, 0.0 }
  0x30   :  { %v175_v39 = vsel %vm151_vm10, %v142_v35, %v163_v7  ;;  %v166_v45 = vmul.f32 -0.2629397, %v112_v40  ;;  %v132_v46 = vadd.f32 %v126_v42, %v119_v41  ;;  %vm154_vm13 = vcmp.gt.f32.partialorder %v112_v40, 0.0 }
  0x31   :  { %v179_v48 = vsel %vm155_vm12, %v143_v38, %v167_v44 }
  0x32   :  { %222 = vrot.lane.b32.xlu1 %v177_v36, %s320_s24  ;;  %v178_v49 = vsel %vm154_vm13, %v112_v40, %v166_v45  ;;  %v145_v50 = vadd.f32 %v139_v47, %v132_v46 }
  0x34   :  { %218 = vrot.lane.b32.xlu2 %v175_v39, %s320_s24  ;;  %v169_v16 = vmul.f32 -0.2629397, %v145_v50  ;;  %vm157_vm14 = vcmp.gt.f32.partialorder %v145_v50, 0.0 }
  0x36   :  { %220 = vrot.lane.b32.xlu0 %v176_v8, %s320_s24  ;;  %v181_v17 = vsel %vm157_vm14, %v145_v50, %v169_v16 }
  0x3a   :  { %228 = vrot.lane.b32.xlu1 %v180_v43, %s320_s24 }
  0x3c   :  { %224 = vrot.lane.b32.xlu2 %v178_v49, %s320_s24 }
  0x3e   :  { %226 = vrot.lane.b32.xlu0 %v179_v48, %s320_s24 }
  0x44   :  { %230 = vrot.lane.b32.xlu2 %v181_v17, %s320_s24 }
  0x86   :  { %v217_v18 = vpop.permute.xlu2 %216 }
  0x87   :  { %250 = vst.msk [vmem:[%s523_s2 + $0x20] sm:$0xff] %vm244_vm0, %v217_v18 }
  0x8e   :  { %v219_v51 = vpop.permute.xlu2 %218 }
  0x8f   :  { %251 = vst.msk [vmem:[%s523_s2 + $0x28] sm:$0x3] %vm247_vm1, %v219_v51 }
  0x94   :  { %v213_v52 = vpop.permute.xlu1 %212 }
  0x95   :  { %248 = vst.msk [vmem:[%s523_s2 + $0x10] sm:$0x3] %vm247_vm1, %v213_v52 }
  0x96   :  { %v225_v0 = vpop.permute.xlu2 %224 }
  0x97   :  { %254 = vst.msk [vmem:[%s523_s2 + $0x40] sm:$0x3] %vm247_vm1, %v225_v0 }
  0x98   :  { %v209_v53 = vpop.permute.xlu0 %208 }
  0x99   :  { %245 = vst.msk [vmem:[%s523_s2] sm:$0xff] %vm244_vm0, %v209_v53 }
  0x9c   :  { %v215_v54 = vpop.permute.xlu1 %214 }
  0x9d   :  { %249 = vst.msk [vmem:[%s523_s2 + $0x18] sm:$0xff] %vm244_vm0, %v215_v54 }
  0x9e   :  { %v231_v56 = vpop.permute.xlu2 %230 }
  0x9f   :  { %257 = vst.msk [vmem:[%s523_s2 + $0x58] sm:$0x3] %vm247_vm1, %v231_v56 }
  0xa0   :  { %v211_v55 = vpop.permute.xlu0 %210 }
  0xa1   :  { %246 = vst.msk [vmem:[%s523_s2 + $0x8] sm:$0xff] %vm244_vm0, %v211_v55 }
  0xa4   :  { %v223_v57 = vpop.permute.xlu1 %222 }
  0xa5   :  { %253 = vst.msk [vmem:[%s523_s2 + $0x38] sm:$0xff] %vm244_vm0, %v223_v57 }
  0xa8   :  { %v221_v58 = vpop.permute.xlu0 %220 }
  0xa9   :  { %252 = vst.msk [vmem:[%s523_s2 + $0x30] sm:$0xff] %vm244_vm0, %v221_v58 }
  0xac   :  { %v229_v59 = vpop.permute.xlu1 %228 }
  0xad   :  { %256 = vst.msk [vmem:[%s523_s2 + $0x50] sm:$0xff] %vm244_vm0, %v229_v59 }
  0xb0   :  { %v227_v60 = vpop.permute.xlu0 %226 }
  0xb1   :  { %255 = vst.msk [vmem:[%s523_s2 + $0x48] sm:$0xff] %vm244_vm0, %v227_v60 }
  0xb2   :  { %262 = vsyncpa [#allocation4], 1 }
  0xb3   :  { %263 = vsyncpa [#allocation5], 1 }

</bundles_post_ra>
